<compile_context>
chip_gen: v7x
topology: tpu7x:2x2x1
jax: 0.10.0
libtpu: 0.0.40
codegen_flags: <defaults>
</compile_context>

<pallas_src>
import functools

import jax
import jax.numpy as jnp
from jax.experimental import pallas as pl
from jax.experimental.pallas import tpu as pltpu


_LANES = 128            # vreg lane width: keep the last dim lane-dense
_SUBLANES = 8           # vreg sublane count
_MAX_TILE_ROWS = 4096   # 4096 * 128 * 4B = 2 MiB per input tile (fp32)


def _mse_kernel(p_ref, r_ref, o_ref, acc_ref, *, inv_n):
    """One row tile: acc(8,128) += partial sums of (r - p)^2; finalize at end."""
    step = pl.program_id(0)

    @pl.when(step == 0)
    def _():
        acc_ref[...] = jnp.zeros_like(acc_ref)

    d = r_ref[...].astype(jnp.float32) - p_ref[...].astype(jnp.float32)
    dsq = d * d
    # Reduce only over the leading (non-layout) axis: this is a handful of
    # elementwise vreg adds on the VPU, leaving the cross-lane reduce for the
    # final step.
    tile_rows = dsq.shape[0]
    acc_ref[...] += jnp.sum(
        dsq.reshape(tile_rows // _SUBLANES, _SUBLANES, _LANES), axis=0
    )

    @pl.when(step == pl.num_programs(0) - 1)
    def _():
        # Single full (XLU) reduce of the vector accumulator, then the mean.
        o_ref[0, 0] = jnp.sum(acc_ref[...]) * jnp.float32(inv_n)


@jax.jit
def mse(pred, real):
    """Pallas equivalent of the PyTorch MSE module's forward."""
    assert pred.shape == real.shape, (pred.shape, real.shape)
    n = pred.size

    p = pred.reshape(-1)
    r = real.reshape(-1)

    # Lane-dense layout: pad to a whole number of (8, 128)-aligned rows.
    rows = -(-n // _LANES)                   # ceil(n / 128)
    rows = -(-rows // _SUBLANES) * _SUBLANES  # round rows up to a multiple of 8
    if rows <= _MAX_TILE_ROWS:
        tile_rows, total_rows = rows, rows
    else:
        tile_rows = _MAX_TILE_ROWS
        total_rows = -(-rows // tile_rows) * tile_rows

    padded_n = total_rows * _LANES
    if padded_n != n:
        # Both operands padded with the same value -> diff == 0 -> no effect
        # on the sum of squared differences.
        p = jnp.pad(p, (0, padded_n - n))
        r = jnp.pad(r, (0, padded_n - n))

    p2 = p.reshape(total_rows, _LANES)
    r2 = r.reshape(total_rows, _LANES)

    kern = functools.partial(_mse_kernel, inv_n=1.0 / float(n))
    out = pl.pallas_call(
        kern,
        out_shape=jax.ShapeDtypeStruct((1, 1), jnp.float32),
        grid_spec=pltpu.PrefetchScalarGridSpec(
            num_scalar_prefetch=0,
            grid=(total_rows // tile_rows,),
            in_specs=[
                pl.BlockSpec((tile_rows, _LANES), lambda i: (i, 0)),
                pl.BlockSpec((tile_rows, _LANES), lambda i: (i, 0)),
            ],
            out_specs=pl.BlockSpec(
                (1, 1), lambda i: (0, 0),
                memory_space=pltpu.MemorySpace.SMEM,
            ),
            scratch_shapes=[pltpu.VMEM((_SUBLANES, _LANES), jnp.float32)],
        ),
        compiler_params=pltpu.CompilerParams(
            # Single reduction axis: the scalar output accumulates across it.
            dimension_semantics=("arbitrary",),
        ),
    )(p2, r2)
    return out[0, 0]


if __name__ == "__main__":
    key = jax.random.PRNGKey(0)
    kp, kr = jax.random.split(key)
    shape = (2, 4, 16, 16)
    pred = jax.random.normal(kp, shape, dtype=jnp.float32)
    real = jax.random.normal(kr, shape, dtype=jnp.float32)

    out = mse(pred, real)
    out = jax.block_until_ready(out)

    ref = jnp.mean((real - pred) ** 2)
    assert out.shape == (), out.shape
    assert out.dtype == jnp.float32, out.dtype
    assert jnp.allclose(out, ref, rtol=1e-6, atol=1e-6), (out, ref)
    print("KERNEL_OK")
</pallas_src>

<mosaic_0001>
module attributes {stable_mosaic.version = 11 : i64} {
  func.func @_mse_kernel(%arg0: i32, %arg1: memref<16x128xf32, #tpu.memory_space<vmem>>, %arg2: memref<16x128xf32, #tpu.memory_space<vmem>>, %arg3: memref<1x1xf32, #tpu.memory_space<smem>>, %arg4: memref<8x128xf32, #tpu.memory_space<vmem>>) attributes {dimension_semantics = [#tpu.dimension_semantics<arbitrary>], iteration_bounds = array<i64: 1>, scalar_prefetch = 0 : i64, scratch_operands = 1 : i64, tpu.core_type = #tpu.core_type<tc>, window_params = [{transform_indices = @transform_0, window_bounds = array<i64: 16, 128>}, {transform_indices = @transform_1, window_bounds = array<i64: 16, 128>}, {transform_indices = @transform_2, window_bounds = array<i64: 1, 1>}]} {
    %c0_i32 = arith.constant 0 : i32
    %0 = arith.cmpi eq, %arg0, %c0_i32 : i32
    %1 = arith.extui %0 : i1 to i32
    %c0_i32_0 = arith.constant 0 : i32
    %2 = arith.cmpi ne, %1, %c0_i32_0 : i32
    scf.if %2 {
      %cst_10 = arith.constant 0.000000e+00 : f32
      %15 = vector.broadcast %cst_10 : f32 to vector<8x128xf32>
      %c0_11 = arith.constant 0 : index
      %c0_12 = arith.constant 0 : index
      %16 = vector.load %arg4[%c0_11, %c0_12] : memref<8x128xf32, #tpu.memory_space<vmem>>, vector<8x128xf32>
      tpu.vector_store %arg4[%c0_11, %c0_12], %15 {strides = array<i32>} : memref<8x128xf32, #tpu.memory_space<vmem>>, vector<8x128xf32>,
    } else {
    }
    %c0 = arith.constant 0 : index
    %c0_1 = arith.constant 0 : index
    %3 = vector.load %arg2[%c0, %c0_1] : memref<16x128xf32, #tpu.memory_space<vmem>>, vector<16x128xf32>
    %c0_2 = arith.constant 0 : index
    %c0_3 = arith.constant 0 : index
    %4 = vector.load %arg1[%c0_2, %c0_3] : memref<16x128xf32, #tpu.memory_space<vmem>>, vector<16x128xf32>
    %5 = arith.subf %3, %4 : vector<16x128xf32>
    %6 = arith.mulf %5, %5 : vector<16x128xf32>
    %c0_4 = arith.constant 0 : index
    %c0_5 = arith.constant 0 : index
    %7 = vector.load %arg4[%c0_4, %c0_5] : memref<8x128xf32, #tpu.memory_space<vmem>>, vector<8x128xf32>
    %8 = vector.shape_cast %6 : vector<16x128xf32> to vector<2x8x128xf32>
    %cst = arith.constant dense<0.000000e+00> : vector<8x128xf32>
    %9 = vector.multi_reduction <add>, %8, %cst [0] : vector<2x8x128xf32> to vector<8x128xf32>
    %10 = arith.addf %7, %9 : vector<8x128xf32>
    %c0_6 = arith.constant 0 : index
    %c0_7 = arith.constant 0 : index
    %11 = vector.load %arg4[%c0_6, %c0_7] : memref<8x128xf32, #tpu.memory_space<vmem>>, vector<8x128xf32>
    tpu.vector_store %arg4[%c0_6, %c0_7], %10 {strides = array<i32>} : memref<8x128xf32, #tpu.memory_space<vmem>>, vector<8x128xf32>,
    %c0_i32_8 = arith.constant 0 : i32
    %12 = arith.cmpi eq, %arg0, %c0_i32_8 : i32
    %13 = arith.extui %12 : i1 to i32
    %c0_i32_9 = arith.constant 0 : i32
    %14 = arith.cmpi ne, %13, %c0_i32_9 : i32
    scf.if %14 {
      %c0_10 = arith.constant 0 : index
      %c0_11 = arith.constant 0 : index
      %15 = vector.load %arg4[%c0_10, %c0_11] : memref<8x128xf32, #tpu.memory_space<vmem>>, vector<8x128xf32>
      %16 = vector.shape_cast %15 : vector<8x128xf32> to vector<1x8x128xf32>
      %cst_12 = arith.constant dense<0.000000e+00> : vector<1xf32>
      %17 = vector.multi_reduction <add>, %16, %cst_12 [1, 2] : vector<1x8x128xf32> to vector<1xf32>
      %18 = vector.shape_cast %17 : vector<1xf32> to vector<1x1x1xf32>
      %19 = vector.extract %18[0, 0, 0] : f32 from vector<1x1x1xf32>
      %cst_13 = arith.constant 4.8828125E-4 : f32
      %20 = arith.mulf %19, %cst_13 : f32
      %c0_14 = arith.constant 0 : index
      %c0_15 = arith.constant 0 : index
      %21 = memref.load %arg3[%c0_14, %c0_15] : memref<1x1xf32, #tpu.memory_space<smem>>
      memref.store %20, %arg3[%c0_14, %c0_15] : memref<1x1xf32, #tpu.memory_space<smem>>
    } else {
    }
    return
  }
  func.func @transform_0(%arg0: i32) -> (i32, i32) {
    %c0_i32 = arith.constant 0 : i32
    %c0_i32_0 = arith.constant 0 : i32
    return %arg0, %c0_i32 : i32, i32
  }
  func.func @transform_1(%arg0: i32) -> (i32, i32) {
    %c0_i32 = arith.constant 0 : i32
    %c0_i32_0 = arith.constant 0 : i32
    return %arg0, %c0_i32 : i32, i32
  }
  func.func @transform_2(%arg0: i32) -> (i32, i32) {
    %c0_i32 = arith.constant 0 : i32
    %c0_i32_0 = arith.constant 0 : i32
    %c0_i32_1 = arith.constant 0 : i32
    return %c0_i32, %c0_i32_0 : i32, i32
  }
}

</mosaic_0001>

<bundles_post_ra>
// kernel: mse.1
= control target key start
LH: loop header
LB: loop body
LE: loop exit
PB: predicated region body
PF: predicated region fallthrough
CT: control target
= control target key end

     0   :  { %s113_s0 = inlined_call_operand.vmem [shape: f32[16,128], index: 0, kind: input, shape index: {}]   ;;  %s114_s1 = inlined_call_operand.vmem [shape: f32[16,128], index: 1, kind: input, shape index: {}]   ;;  %s115_s2 = inlined_call_operand.hbm [shape: f32[1,1], index: 2, kind: output, shape index: {}]  }
   0x1   :  { %v17_v0 = vld [vmem:[%s114_s1] sm:$0xff]  ;;  %v18_v1 = vld [vmem:[%s114_s1 + $0x8] sm:$0xff] }
   0x2   :  { %v19_v2 = vld [vmem:[%s113_s0] sm:$0xff]  ;;  %v20_v3 = vld [vmem:[%s113_s0 + $0x8] sm:$0xff] }
   0x3   :  { %v21_v4 = vsub.f32 %v17_v0, %v19_v2 }
   0x4   :  { %7 = vsyncpa [#allocation4], 0  ;;  %v22_v5 = vsub.f32 %v18_v1, %v20_v3  ;;  %s61_s19 = scalar_lea.hbm %s115_s2, 16 }
   0x5   :  { %v23_v6 = vmul.f32 %v21_v4, %v21_v4  ;;  %p62_p0 = scmp.ne.s32.totalorder %s115_s2, %s61_s19  ;;  %p65_p1 = scmp.lt.u32.totalorder %s61_s19, %s115_s2 }
   0x6   :  { %v24_v7 = vmul.f32 %v22_v5, %v22_v5 }
   0x7   :  { %p67_p2 = pnand %p65_p1, %p62_p0 }
   0x8   :  { %v26_v8 = vadd.f32 %v24_v7, %v23_v6 }
   0xa   :  { %33 = vadd.xlane.f32.xlu0 %v26_v8 }
  0x97   :  { %v34_v9 = vpop.xlane.xlu0 %33 }
  0x98   :  { %v35_v10 = vrot.slane %v34_v9, 4 }
  0x9a   :  { %v36_v11 = vadd.f32 %v35_v10, %v34_v9 }
  0x9c   :  { %v37_v12 = vrot.slane %v36_v11, 2 }
  0x9e   :  { %v38_v13 = vadd.f32 %v37_v12, %v36_v11 }
  0xa0   :  { %v39_v14 = vrot.slane %v38_v13, 1 }
  0xa2   :  { %v40_v15 = vadd.f32 %v39_v14, %v38_v13 }
  0xa4   :  { %58 = vpush %v40_v15 }
  0xd5   :  { %s59_s1 = spop %58 }
  0xd6   :  { %s42_s17 = smul.f32 0.00048828125, %s59_s1 }
  0xd8   :  { %44 = sst [smem:[#allocation3]] %s42_s17 }
  0xd9   :  { %70 = shalt.err (!%p67_p2)
}
  0xda   :  { %s73_s24 = smov [#allocation3]  }
  0xdb   :  { %52 = dma.smem_to_hbm %s73_s24, 16, %s115_s2, [#allocation4]  }
  0xdc   :  { %71 = dma.done.wait [#allocation4], 16  }
  0xdd   :  { %72 = vsyncadd [#allocation4], 4294967280 }
  0xde   :  { %56 = sfence }
  0xdf   :  { %57 = vsyncpa [#allocation4], 1 }

</bundles_post_ra>
